<compile_context>
chip_gen: v5e
topology: v5e:2x2
jax: 0.10.0
libtpu: 0.0.40
codegen_flags: <defaults>
</compile_context>

<pallas_src>
import jax
import jax.numpy as jnp
from jax.experimental import pallas as pl
from jax.experimental.pallas import tpu as pltpu


def _round_up(a: int, b: int) -> int:
    return ((a + b - 1) // b) * b


def _vmem_limit_bytes() -> int:
    """Per-generation scoped-VMEM limit (v5e/v6e ~96 MiB, v7x ~48 MiB)."""
    cap = 64 * 1024 * 1024  # conservative fallback (v7x per-TC physical)
    try:
        info = pltpu.get_tpu_info()
        for name in ("vmem_capacity_bytes", "vmem_size_bytes", "vmem_bytes"):
            v = getattr(info, name, None)
            if v:
                cap = int(v)
                break
    except Exception:
        pass
    return int(min(cap * 3 // 4, 96 * 1024 * 1024))


def _patch_embed_kernel(x_ref, w_ref, b_ref, o_ref):
    # x_ref: (tm, K_pad)    patch tile
    # w_ref: (K_pad, tn)    projection weight (transposed, lane-padded)
    # b_ref: (1, tn)        bias (lane-padded, fp32)
    # o_ref: (tm, tn)
    acc = jnp.dot(x_ref[...], w_ref[...], preferred_element_type=jnp.float32)
    o_ref[...] = (acc + b_ref[...].astype(jnp.float32)).astype(o_ref.dtype)


def patch_embed_3d(x, weight, bias, patch_size, *, use_bf16_inputs=True,
                   out_dtype=None):
    """Pallas equivalent of PatchEmbed3D.forward.

    Args:
      x:      (B, C, D, H, W) NCDHW input (PyTorch convention).
      weight: (ED, C, pd, ph, pw) Conv3d weight.
      bias:   (ED,) Conv3d bias.
      patch_size: (pd, ph, pw) == Conv3d kernel_size == stride.
      use_bf16_inputs: cast patches/weight to bf16 for the MXU matmul
        (fp32 accumulation + fp32 bias-add kept).  Default True: this op is
        HBM-bandwidth-bound, so halving read bytes is a near-2x win.
      out_dtype: output dtype (defaults to x.dtype).

    Returns:
      (out, (Dp, Hp, Wp)) with out of shape (B, N, ED), N = Dp*Hp*Wp.
    """
    B, C, D, H, W = x.shape
    pd, ph, pw = patch_size
    ED = weight.shape[0]
    assert weight.shape == (ED, C, pd, ph, pw), weight.shape
    Dp, Hp, Wp = D // pd, H // ph, W // pw
    N = Dp * Hp * Wp
    K = C * pd * ph * pw
    M = B * N
    out_dtype = x.dtype if out_dtype is None else out_dtype
    compute_dtype = jnp.bfloat16 if use_bf16_inputs else x.dtype

    # --- Patch extraction: a standalone, materialized XLA transpose so the
    # kernel's input DMA reads dense (tm, K) rows (NOT fused into the DMA,
    # which would degrade it to tiny strided runs).  Cast first so the
    # materialized copy is already bf16 when enabled.
    xc = x.astype(compute_dtype)
    xp = xc.reshape(B, C, Dp, pd, Hp, ph, Wp, pw)
    xp = xp.transpose(0, 2, 4, 6, 1, 3, 5, 7).reshape(M, K)          # (M, K)

    w2d = weight.reshape(ED, K).T.astype(compute_dtype)               # (K, ED)
    b2d = bias.reshape(1, ED).astype(jnp.float32)                     # (1, ED)

    # --- Lane-dense padding of the contraction (K) and output (ED) dims.
    # Zero padding is numerically exact; padded ED columns are sliced away.
    K_pad = _round_up(K, 128)
    ED_pad = _round_up(ED, 128)
    if K_pad != K:
        xp = jnp.pad(xp, ((0, 0), (0, K_pad - K)))
        w2d = jnp.pad(w2d, ((0, K_pad - K), (0, 0)))
    if ED_pad != ED:
        w2d = jnp.pad(w2d, ((0, 0), (0, ED_pad - ED)))
        b2d = jnp.pad(b2d, ((0, 0), (0, ED_pad - ED)))

    in_itemsize = jnp.dtype(compute_dtype).itemsize
    out_itemsize = jnp.dtype(out_dtype).itemsize

    # --- VMEM budget (explicit, per generation) and tiling.
    vmem_limit = _vmem_limit_bytes()
    budget = int(vmem_limit * 0.85)          # headroom for compiler scratch

    # ED tiling: keep the whole weight resident unless it would blow the
    # budget, in which case tile ED (x block index stays constant over that
    # axis, so the x tile is not re-DMA'd).
    w_col_bytes = K_pad * in_itemsize
    if K_pad * ED_pad * in_itemsize <= budget // 3:
        tn = ED_pad
    else:
        tn = max(128, ((budget // 3) // w_col_bytes) // 128 * 128)
        tn = min(tn, ED_pad)
    grid_n = pl.cdiv(ED_pad, tn)

    # M tiling: as large as fits (counting the resident weight+bias), cap 1024.
    resident_w = 2 * (K_pad * tn * in_itemsize + tn * 4)   # conservative: 2 bufs
    bytes_per_row = 2 * (K_pad * in_itemsize + tn * out_itemsize)  # dbl-buffered
    remaining = max(budget - resident_w, bytes_per_row * 128)
    tm_cap = max(128, (remaining // bytes_per_row) // 128 * 128)
    tm = int(min(1024, tm_cap))
    if tm >= M:
        tm = M                                    # full-dim block (always legal)
    # Keep >= 2 M-blocks when the problem is big enough (v7x has 2 TCs).
    if pl.cdiv(M, tm) < 2 and M >= 256:
        tm = max(128, _round_up(pl.cdiv(M, 2), 128))
        if tm >= M:
            tm = M
    grid_m = pl.cdiv(M, tm)

    cost = pl.CostEstimate(
        flops=2 * M * K_pad * ED_pad,
        bytes_accessed=(M * K_pad * in_itemsize
                        + K_pad * ED_pad * in_itemsize
                        + ED_pad * 4
                        + M * ED_pad * out_itemsize),
        transcendentals=0,
    )

    def _call(weight_single_buffered: bool):
        if weight_single_buffered:
            w_spec = pl.BlockSpec((K_pad, tn), lambda i, j: (0, j),
                                  pipeline_mode=pl.Buffered(1))
            b_spec = pl.BlockSpec((1, tn), lambda i, j: (0, j),
                                  pipeline_mode=pl.Buffered(1))
        else:
            w_spec = pl.BlockSpec((K_pad, tn), lambda i, j: (0, j))
            b_spec = pl.BlockSpec((1, tn), lambda i, j: (0, j))
        fn = pl.pallas_call(
            _patch_embed_kernel,
            out_shape=jax.ShapeDtypeStruct((M, ED_pad), out_dtype),
            grid_spec=pltpu.PrefetchScalarGridSpec(
                num_scalar_prefetch=0,
                grid=(grid_m, grid_n),
                in_specs=[
                    pl.BlockSpec((tm, K_pad), lambda i, j: (i, 0)),
                    w_spec,
                    b_spec,
                ],
                out_specs=pl.BlockSpec((tm, tn), lambda i, j: (i, j)),
            ),
            compiler_params=pltpu.CompilerParams(
                dimension_semantics=("parallel", "parallel"),
                vmem_limit_bytes=vmem_limit,
            ),
            cost_estimate=cost,
        )
        return fn(xp, w2d, b2d)

    # Single-buffer the constant weight/bias blocks; fall back transparently
    # if this Pallas build rejects pipeline_mode=Buffered(1).
    try:
        out = jax.block_until_ready(_call(weight_single_buffered=(grid_n == 1)))
    except Exception:
        out = _call(weight_single_buffered=False)

    if ED_pad != ED:
        out = out[:, :ED]
    out = out.reshape(B, N, ED)
    return out, (Dp, Hp, Wp)


if __name__ == "__main__":
    # Small shapes consistent with the module: B=2, in_ch=4, spatial 8^3,
    # patch_size (4,4,4), embed_dim=32.
    B, C, D, H, W = 2, 4, 8, 8, 8
    patch_size = (4, 4, 4)
    ED = 32

    key = jax.random.PRNGKey(0)
    kx, kw, kb = jax.random.split(key, 3)
    x = jax.random.normal(kx, (B, C, D, H, W), dtype=jnp.float32)
    weight = jax.random.normal(kw, (ED, C) + patch_size, dtype=jnp.float32) * 0.02
    bias = jax.random.normal(kb, (ED,), dtype=jnp.float32) * 0.02

    # Reference: strided conv (identical semantics to Conv3d with
    # kernel_size == stride) + flatten(2).transpose(1, 2).
    ref = jax.lax.conv_general_dilated(
        x, weight, window_strides=patch_size, padding="VALID",
        dimension_numbers=("NCDHW", "OIDHW", "NCDHW"))
    ref = ref + bias.reshape(1, ED, 1, 1, 1)
    Bv, EDv, Dp_r, Hp_r, Wp_r = ref.shape
    ref = ref.reshape(Bv, EDv, Dp_r * Hp_r * Wp_r).transpose(0, 2, 1)

    # fp32 path — tight tolerance.
    out_f32, grid3 = patch_embed_3d(x, weight, bias, patch_size,
                                    use_bf16_inputs=False)
    out_f32 = jax.block_until_ready(out_f32)
    assert grid3 == (Dp_r, Hp_r, Wp_r), (grid3, (Dp_r, Hp_r, Wp_r))
    assert out_f32.shape == ref.shape, (out_f32.shape, ref.shape)
    assert jnp.allclose(out_f32, ref, atol=1e-4, rtol=1e-4), float(
        jnp.max(jnp.abs(out_f32 - ref)))

    # Default path: bf16 inputs (fp32 accumulation) — relaxed tolerance.
    out_bf16, _ = patch_embed_3d(x, weight, bias, patch_size)
    out_bf16 = jax.block_until_ready(out_bf16)
    assert out_bf16.shape == ref.shape, (out_bf16.shape, ref.shape)
    assert jnp.allclose(out_bf16, ref, atol=6e-2, rtol=6e-2), float(
        jnp.max(jnp.abs(out_bf16 - ref)))

    print("KERNEL_OK")
</pallas_src>

<mosaic_0001>
module attributes {stable_mosaic.version = 11 : i64} {
  func.func @_patch_embed_kernel(%arg0: i32, %arg1: i32, %arg2: memref<16x256xf32, #tpu.memory_space<vmem>>, %arg3: memref<256x128xf32, #tpu.memory_space<vmem>>, %arg4: memref<1x128xf32, #tpu.memory_space<vmem>>, %arg5: memref<16x128xf32, #tpu.memory_space<vmem>>) attributes {dimension_semantics = [#tpu.dimension_semantics<parallel>, #tpu.dimension_semantics<parallel>], iteration_bounds = array<i64: 1, 1>, scalar_prefetch = 0 : i64, scratch_operands = 0 : i64, tpu.core_type = #tpu.core_type<tc>, window_params = [{transform_indices = @transform_0, window_bounds = array<i64: 16, 256>}, {pipeline_mode = #tpu.pipeline_mode<synchronous>, transform_indices = @transform_1, window_bounds = array<i64: 256, 128>}, {pipeline_mode = #tpu.pipeline_mode<synchronous>, transform_indices = @transform_2, window_bounds = array<i64: 1, 128>}, {transform_indices = @transform_3, window_bounds = array<i64: 16, 128>}]} {
    %c0 = arith.constant 0 : index
    %c0_0 = arith.constant 0 : index
    %0 = vector.load %arg2[%c0, %c0_0] : memref<16x256xf32, #tpu.memory_space<vmem>>, vector<16x256xf32>
    %c0_1 = arith.constant 0 : index
    %c0_2 = arith.constant 0 : index
    %1 = vector.load %arg3[%c0_1, %c0_2] : memref<256x128xf32, #tpu.memory_space<vmem>>, vector<256x128xf32>
    %cst = arith.constant dense<0.000000e+00> : vector<16x128xf32>
    %2 = tpu.matmul %0, %1, %cst {dimension_numbers = #tpu.dot_dimension_numbers<[1], [0], [0], [1], [0, 0, 1, 1], [], []>} : vector<16x256xf32>, vector<256x128xf32>, vector<16x128xf32> -> vector<16x128xf32>
    %c0_3 = arith.constant 0 : index
    %c0_4 = arith.constant 0 : index
    %3 = vector.load %arg4[%c0_3, %c0_4] : memref<1x128xf32, #tpu.memory_space<vmem>>, vector<1x128xf32>
    %4 = vector.broadcast %3 : vector<1x128xf32> to vector<16x128xf32>
    %5 = arith.addf %2, %4 : vector<16x128xf32>
    %c0_5 = arith.constant 0 : index
    %c0_6 = arith.constant 0 : index
    %6 = vector.load %arg5[%c0_5, %c0_6] : memref<16x128xf32, #tpu.memory_space<vmem>>, vector<16x128xf32>
    tpu.vector_store %arg5[%c0_5, %c0_6], %5 {strides = array<i32>} : memref<16x128xf32, #tpu.memory_space<vmem>>, vector<16x128xf32>,
    return
  }
  func.func @transform_0(%arg0: i32, %arg1: i32) -> (i32, i32) {
    %c0_i32 = arith.constant 0 : i32
    %c0_i32_0 = arith.constant 0 : i32
    return %arg0, %c0_i32 : i32, i32
  }
  func.func @transform_1(%arg0: i32, %arg1: i32) -> (i32, i32) {
    %c0_i32 = arith.constant 0 : i32
    %c0_i32_0 = arith.constant 0 : i32
    return %c0_i32, %arg1 : i32, i32
  }
  func.func @transform_2(%arg0: i32, %arg1: i32) -> (i32, i32) {
    %c0_i32 = arith.constant 0 : i32
    %c0_i32_0 = arith.constant 0 : i32
    return %c0_i32, %arg1 : i32, i32
  }
  func.func @transform_3(%arg0: i32, %arg1: i32) -> (i32, i32) {
    %c0_i32 = arith.constant 0 : i32
    return %arg0, %arg1 : i32, i32
  }
}

module attributes {stable_mosaic.version = 11 : i64} {
  func.func @_patch_embed_kernel(%arg0: i32, %arg1: i32, %arg2: memref<16x256xf32, #tpu.memory_space<vmem>>, %arg3: memref<256x128xf32, #tpu.memory_space<vmem>>, %arg4: memref<1x128xf32, #tpu.memory_space<vmem>>, %arg5: memref<16x128xf32, #tpu.memory_space<vmem>>) attributes {dimension_semantics = [#tpu.dimension_semantics<parallel>, #tpu.dimension_semantics<parallel>], iteration_bounds = array<i64: 1, 1>, scalar_prefetch = 0 : i64, scratch_operands = 0 : i64, tpu.core_type = #tpu.core_type<tc>, window_params = [{transform_indices = @transform_0, window_bounds = array<i64: 16, 256>}, {transform_indices = @transform_1, window_bounds = array<i64: 256, 128>}, {transform_indices = @transform_2, window_bounds = array<i64: 1, 128>}, {transform_indices = @transform_3, window_bounds = array<i64: 16, 128>}]} {
    %c0 = arith.constant 0 : index
    %c0_0 = arith.constant 0 : index
    %0 = vector.load %arg2[%c0, %c0_0] : memref<16x256xf32, #tpu.memory_space<vmem>>, vector<16x256xf32>
    %c0_1 = arith.constant 0 : index
    %c0_2 = arith.constant 0 : index
    %1 = vector.load %arg3[%c0_1, %c0_2] : memref<256x128xf32, #tpu.memory_space<vmem>>, vector<256x128xf32>
    %cst = arith.constant dense<0.000000e+00> : vector<16x128xf32>
    %2 = tpu.matmul %0, %1, %cst {dimension_numbers = #tpu.dot_dimension_numbers<[1], [0], [0], [1], [0, 0, 1, 1], [], []>} : vector<16x256xf32>, vector<256x128xf32>, vector<16x128xf32> -> vector<16x128xf32>
    %c0_3 = arith.constant 0 : index
    %c0_4 = arith.constant 0 : index
    %3 = vector.load %arg4[%c0_3, %c0_4] : memref<1x128xf32, #tpu.memory_space<vmem>>, vector<1x128xf32>
    %4 = vector.broadcast %3 : vector<1x128xf32> to vector<16x128xf32>
    %5 = arith.addf %2, %4 : vector<16x128xf32>
    %c0_5 = arith.constant 0 : index
    %c0_6 = arith.constant 0 : index
    %6 = vector.load %arg5[%c0_5, %c0_6] : memref<16x128xf32, #tpu.memory_space<vmem>>, vector<16x128xf32>
    tpu.vector_store %arg5[%c0_5, %c0_6], %5 {strides = array<i32>} : memref<16x128xf32, #tpu.memory_space<vmem>>, vector<16x128xf32>,
    return
  }
  func.func @transform_0(%arg0: i32, %arg1: i32) -> (i32, i32) {
    %c0_i32 = arith.constant 0 : i32
    %c0_i32_0 = arith.constant 0 : i32
    return %arg0, %c0_i32 : i32, i32
  }
  func.func @transform_1(%arg0: i32, %arg1: i32) -> (i32, i32) {
    %c0_i32 = arith.constant 0 : i32
    %c0_i32_0 = arith.constant 0 : i32
    return %c0_i32, %arg1 : i32, i32
  }
  func.func @transform_2(%arg0: i32, %arg1: i32) -> (i32, i32) {
    %c0_i32 = arith.constant 0 : i32
    %c0_i32_0 = arith.constant 0 : i32
    return %c0_i32, %arg1 : i32, i32
  }
  func.func @transform_3(%arg0: i32, %arg1: i32) -> (i32, i32) {
    %c0_i32 = arith.constant 0 : i32
    return %arg0, %arg1 : i32, i32
  }
}

</mosaic_0001>

<bundles_post_ra>
// kernel: tpu_custom_call.1
= control target key start
LH: loop header
LB: loop body
LE: loop exit
PB: predicated region body
PF: predicated region fallthrough
CT: control target
= control target key end

     0   :  { %8 = vsyncpa [#allocation3], 0  ;;  %s318_s0 = inlined_call_operand.hbm [shape: f32[16,256], index: 0, kind: input, shape index: {}]   ;;  %s319_s1 = inlined_call_operand.hbm [shape: f32[256,128], index: 1, kind: input, shape index: {}]   ;;  %s320_s2 = inlined_call_operand.vmem [shape: f32[1,128], index: 2, kind: input, shape index: {}]   ;;  %s321_s3 = inlined_call_operand.hbm [shape: f32[16,128], index: 3, kind: output, shape index: {}]  }
   0x1   :  { %9 = vsyncpa [#allocation6], 0 }
   0x2   :  { %10 = vsyncpa [#allocation4], 0  ;;  %s15_s14 = sshll.u32 %s318_s0, 4  ;;  %s273_s15 = smov [#allocation2]   ;;  %s16_s14 = int_to_ptr.hbm [resolvable:$true] %s15_s14 }
   0x3   :  { %s17_s16 = sshll.u32 %s273_s15, 4  ;;  %s28_s19 = sshll.u32 %s319_s1, 4  ;;  %s18_s16 = int_to_ptr.vmem [resolvable:$true] %s17_s16  ;;  %s29_s19 = int_to_ptr.hbm [resolvable:$true] %s28_s19 }
   0x4   :  { %s274_s20 = smov 256   ;;  %s275_s21 = smov 16  }
   0x5   :  { %23 = dma.hbm_to_vmem [thread:$0]  %s16_s14, 512, %s18_s16, [#allocation3], %s274_s20, %s274_s20, %s275_s21  }
   0x6   :  { %s276_s22 = smov [#allocation5]   ;;  %s277_s24 = smov 128  }
   0x7   :  { %s30_s23 = sshll.u32 %s276_s22, 4  ;;  %s278_s25 = smov 8   ;;  %s31_s23 = int_to_ptr.vmem [resolvable:$true] %s30_s23 }
   0x8   :  { %36 = dma.hbm_to_vmem [thread:$0]  %s29_s19, 4096, %s31_s23, [#allocation6], %s277_s24, %s277_s24, %s278_s25  }
   0x9   :  { %267 = dma.done.wait [#allocation3], 512  }
   0xa   :  { %268 = vsyncadd [#allocation3], 4294966784 }
   0xb   :  { %269 = dma.done.wait [#allocation6], 4096  }
   0xc   :  { %270 = vsyncadd [#allocation6], 4294963200  ;;  %v66_v0 = vld [vmem:[#allocation5 + $0x78] sm:$0xff]  ;;  %v65_v1 = vld [vmem:[#allocation5 + $0x70] sm:$0xff]  ;;  %s279_s26 = smov [#allocation7]   ;;  %s141_s30 = sshll.u32 %s321_s3, 4  ;;  %s142_s30 = int_to_ptr.hbm [resolvable:$true] %s141_s30 }
   0xd   :  { %v82_v2 = vld [vmem:[#allocation5 + $0xf8] sm:$0xff]  ;;  %155 = vmatpush.msra.mxu2 %v66_v0  ;;  %v81_v3 = vld [vmem:[#allocation5 + $0xf0] sm:$0xff]  ;;  %v64_v4 = vld [vmem:[#allocation5 + $0x68] sm:$0xff]  ;;  %87 = vmatpush.msra.mxu0 %v66_v0  ;;  %s139_s27 = sshll.u32 %s279_s26, 4  ;;  %s140_s27 = int_to_ptr.vmem [resolvable:$true] %s139_s27 }
   0xe   :  { %171 = vmatpush.msra.mxu3 %v82_v2  ;;  %v80_v5 = vld [vmem:[#allocation5 + $0xe8] sm:$0xff]  ;;  %110 = vmatpush.msra.mxu1 %v82_v2  ;;  %v63_v6 = vld [vmem:[#allocation5 + $0x60] sm:$0xff]  ;;  %v62_v8 = vld [vmem:[#allocation5 + $0x58] sm:$0xff] }
   0xf   :  { %156 = vmatpush.msra.mxu2 %v65_v1  ;;  %88 = vmatpush.msra.mxu0 %v65_v1  ;;  %v79_v7 = vld [vmem:[#allocation5 + $0xe0] sm:$0xff]  ;;  %v78_v9 = vld [vmem:[#allocation5 + $0xd8] sm:$0xff]  ;;  %v61_v10 = vld [vmem:[#allocation5 + $0x50] sm:$0xff] }
  0x10   :  { %172 = vmatpush.msra.mxu3 %v81_v3  ;;  %111 = vmatpush.msra.mxu1 %v81_v3  ;;  %v77_v11 = vld [vmem:[#allocation5 + $0xd0] sm:$0xff]  ;;  %v60_v12 = vld [vmem:[#allocation5 + $0x48] sm:$0xff]  ;;  %v59_v14 = vld [vmem:[#allocation5 + $0x40] sm:$0xff] }
  0x11   :  { %157 = vmatpush.msra.mxu2 %v64_v4  ;;  %89 = vmatpush.msra.mxu0 %v64_v4  ;;  %v76_v13 = vld [vmem:[#allocation5 + $0xc8] sm:$0xff]  ;;  %v75_v15 = vld [vmem:[#allocation5 + $0xc0] sm:$0xff]  ;;  %v58_v16 = vld [vmem:[#allocation5 + $0x38] sm:$0xff] }
  0x12   :  { %173 = vmatpush.msra.mxu3 %v80_v5  ;;  %112 = vmatpush.msra.mxu1 %v80_v5  ;;  %v74_v17 = vld [vmem:[#allocation5 + $0xb8] sm:$0xff]  ;;  %v57_v18 = vld [vmem:[#allocation5 + $0x30] sm:$0xff]  ;;  %v56_v20 = vld [vmem:[#allocation5 + $0x28] sm:$0xff] }
  0x13   :  { %158 = vmatpush.msra.mxu2 %v63_v6  ;;  %90 = vmatpush.msra.mxu0 %v63_v6  ;;  %v73_v19 = vld [vmem:[#allocation5 + $0xb0] sm:$0xff]  ;;  %v72_v21 = vld [vmem:[#allocation5 + $0xa8] sm:$0xff]  ;;  %v55_v22 = vld [vmem:[#allocation5 + $0x20] sm:$0xff] }
  0x14   :  { %174 = vmatpush.msra.mxu3 %v79_v7  ;;  %113 = vmatpush.msra.mxu1 %v79_v7  ;;  %v71_v23 = vld [vmem:[#allocation5 + $0xa0] sm:$0xff]  ;;  %v54_v24 = vld [vmem:[#allocation5 + $0x18] sm:$0xff]  ;;  %v53_v26 = vld [vmem:[#allocation5 + $0x10] sm:$0xff] }
  0x15   :  { %159 = vmatpush.msra.mxu2 %v62_v8  ;;  %91 = vmatpush.msra.mxu0 %v62_v8  ;;  %v70_v25 = vld [vmem:[#allocation5 + $0x98] sm:$0xff]  ;;  %v69_v27 = vld [vmem:[#allocation5 + $0x90] sm:$0xff]  ;;  %v52_v28 = vld [vmem:[#allocation5 + $0x8] sm:$0xff] }
  0x16   :  { %175 = vmatpush.msra.mxu3 %v78_v9  ;;  %114 = vmatpush.msra.mxu1 %v78_v9  ;;  %v68_v29 = vld [vmem:[#allocation5 + $0x88] sm:$0xff]  ;;  %v51_v30 = vld [vmem:[#allocation5] sm:$0xff]  ;;  %v49_v32 = vld [vmem:[#allocation2 + $0x10] sm:$0xff] }
  0x17   :  { %160 = vmatpush.msra.mxu2 %v61_v10  ;;  %92 = vmatpush.msra.mxu0 %v61_v10  ;;  %v67_v31 = vld [vmem:[#allocation5 + $0x80] sm:$0xff]  ;;  %v50_v33 = vld [vmem:[#allocation2 + $0x18] sm:$0xff]  ;;  %v48_v35 = vld [vmem:[#allocation2 + $0x8] sm:$0xff] }
  0x18   :  { %176 = vmatpush.msra.mxu3 %v77_v11  ;;  %115 = vmatpush.msra.mxu1 %v77_v11  ;;  %v47_v34 = vld [vmem:[#allocation2] sm:$0xff] }
  0x19   :  { %161 = vmatpush.msra.mxu2 %v60_v12  ;;  %93 = vmatpush.msra.mxu0 %v60_v12  ;;  %v194_v36 = vld [vmem:[%s320_s2] ss:$0 sm:$0xff] }
  0x1a   :  { %177 = vmatpush.msra.mxu3 %v76_v13  ;;  %116 = vmatpush.msra.mxu1 %v76_v13 }
  0x1b   :  { %162 = vmatpush.msra.mxu2 %v59_v14  ;;  %94 = vmatpush.msra.mxu0 %v59_v14 }
  0x1c   :  { %178 = vmatpush.msra.mxu3 %v75_v15  ;;  %117 = vmatpush.msra.mxu1 %v75_v15 }
  0x1d   :  { %163 = vmatpush.msra.mxu2 %v58_v16  ;;  %95 = vmatpush.msra.mxu0 %v58_v16 }
  0x1e   :  { %179 = vmatpush.msra.mxu3 %v74_v17  ;;  %118 = vmatpush.msra.mxu1 %v74_v17 }
  0x1f   :  { %164 = vmatpush.msra.mxu2 %v57_v18  ;;  %96 = vmatpush.msra.mxu0 %v57_v18 }
  0x20   :  { %180 = vmatpush.msra.mxu3 %v73_v19  ;;  %119 = vmatpush.msra.mxu1 %v73_v19 }
  0x21   :  { %165 = vmatpush.msra.mxu2 %v56_v20  ;;  %97 = vmatpush.msra.mxu0 %v56_v20 }
  0x22   :  { %181 = vmatpush.msra.mxu3 %v72_v21  ;;  %120 = vmatpush.msra.mxu1 %v72_v21 }
  0x23   :  { %166 = vmatpush.msra.mxu2 %v55_v22  ;;  %98 = vmatpush.msra.mxu0 %v55_v22 }
  0x24   :  { %182 = vmatpush.msra.mxu3 %v71_v23  ;;  %121 = vmatpush.msra.mxu1 %v71_v23 }
  0x25   :  { %167 = vmatpush.msra.mxu2 %v54_v24  ;;  %99 = vmatpush.msra.mxu0 %v54_v24 }
  0x26   :  { %183 = vmatpush.msra.mxu3 %v70_v25  ;;  %122 = vmatpush.msra.mxu1 %v70_v25 }
  0x27   :  { %168 = vmatpush.msra.mxu2 %v53_v26  ;;  %100 = vmatpush.msra.mxu0 %v53_v26 }
  0x28   :  { %184 = vmatpush.msra.mxu3 %v69_v27  ;;  %123 = vmatpush.msra.mxu1 %v69_v27 }
  0x29   :  { %169 = vmatpush.msra.mxu2 %v52_v28  ;;  %101 = vmatpush.msra.mxu0 %v52_v28 }
  0x2a   :  { %185 = vmatpush.msra.mxu3 %v68_v29  ;;  %124 = vmatpush.msra.mxu1 %v68_v29 }
  0x2b   :  { %170 = vmatpush.msra.mxu2 %v51_v30  ;;  %102 = vmatpush.msra.mxu0 %v51_v30 }
  0x2c   :  { %186 = vmatpush.msra.mxu3 %v67_v31  ;;  %106 = vmatmul.f32.vlgmr.msra.gmra.mxu2 %v49_v32 }
  0x2d   :  { %129 = vmatmul.f32.vlgmr.msra.gmra.mxu3 %v50_v33  ;;  %125 = vmatpush.msra.mxu1 %v67_v31 }
  0x2e   :  { %103 = vmatmul.f32.vlgmr.msra.gmra.mxu0 %v47_v34  ;;  %126 = vmatmul.f32.vlgmr.msra.gmra.mxu1 %v48_v35 }
  0xab   :  { %v104_v37 = vpop.f32.mrf.mxu0  ;;  %v127_v38 = vpop.f32.mrf.mxu1 }
  0xac   :  { %v105_v39 = vadd.f32 %v194_v36, %v104_v37 }
  0xae   :  { %v128_v40 = vadd.f32 %v127_v38, %v105_v39 }
  0xaf   :  { %v107_v41 = vpop.f32.mrf.mxu2 }
  0xb0   :  { %v130_v42 = vpop.f32.mrf.mxu3  ;;  %v108_v43 = vadd.f32 %v194_v36, %v107_v41  ;;  %133 = vst [vmem:[#allocation7] sm:$0xff] %v128_v40 }
  0xb2   :  { %v131_v44 = vadd.f32 %v130_v42, %v108_v43 }
  0xb4   :  { %134 = vst [vmem:[#allocation7 + $0x8] sm:$0xff] %v131_v44 }
  0xb5   :  { %147 = dma.vmem_to_hbm [thread:$0]  %s140_s27, 256, %s142_s30, [#allocation4], %s277_s24, %s277_s24, %s278_s25  }
  0xb6   :  { %271 = dma.done.wait [#allocation4], 256  }
  0xb7   :  { %272 = vsyncadd [#allocation4], 4294967040 }
  0xb8   :  { %152 = vsyncpa [#allocation3], 1 }
  0xb9   :  { %153 = vsyncpa [#allocation6], 1 }
  0xba   :  { %154 = vsyncpa [#allocation4], 1 }

// kernel: tpu_custom_call.1
= control target key start
LH: loop header
LB: loop body
LE: loop exit
PB: predicated region body
PF: predicated region fallthrough
CT: control target
= control target key end

     0   :  { %8 = vsyncpa [#allocation3], 0  ;;  %s318_s0 = inlined_call_operand.hbm [shape: f32[16,256], index: 0, kind: input, shape index: {}]   ;;  %s319_s1 = inlined_call_operand.hbm [shape: f32[256,128], index: 1, kind: input, shape index: {}]   ;;  %s320_s2 = inlined_call_operand.vmem [shape: f32[1,128], index: 2, kind: input, shape index: {}]   ;;  %s321_s3 = inlined_call_operand.hbm [shape: f32[16,128], index: 3, kind: output, shape index: {}]  }
   0x1   :  { %9 = vsyncpa [#allocation6], 0 }
   0x2   :  { %10 = vsyncpa [#allocation4], 0  ;;  %s15_s14 = sshll.u32 %s318_s0, 4  ;;  %s273_s15 = smov [#allocation2]   ;;  %s16_s14 = int_to_ptr.hbm [resolvable:$true] %s15_s14 }
   0x3   :  { %s17_s16 = sshll.u32 %s273_s15, 4  ;;  %s28_s19 = sshll.u32 %s319_s1, 4  ;;  %s18_s16 = int_to_ptr.vmem [resolvable:$true] %s17_s16  ;;  %s29_s19 = int_to_ptr.hbm [resolvable:$true] %s28_s19 }
   0x4   :  { %s274_s20 = smov 256   ;;  %s275_s21 = smov 16  }
   0x5   :  { %23 = dma.hbm_to_vmem [thread:$0]  %s16_s14, 512, %s18_s16, [#allocation3], %s274_s20, %s274_s20, %s275_s21  }
   0x6   :  { %s276_s22 = smov [#allocation5]   ;;  %s277_s24 = smov 128  }
   0x7   :  { %s30_s23 = sshll.u32 %s276_s22, 4  ;;  %s278_s25 = smov 8   ;;  %s31_s23 = int_to_ptr.vmem [resolvable:$true] %s30_s23 }
   0x8   :  { %36 = dma.hbm_to_vmem [thread:$0]  %s29_s19, 4096, %s31_s23, [#allocation6], %s277_s24, %s277_s24, %s278_s25  }
   0x9   :  { %267 = dma.done.wait [#allocation3], 512  }
   0xa   :  { %268 = vsyncadd [#allocation3], 4294966784 }
   0xb   :  { %269 = dma.done.wait [#allocation6], 4096  }
   0xc   :  { %270 = vsyncadd [#allocation6], 4294963200  ;;  %v66_v0 = vld [vmem:[#allocation5 + $0x78] sm:$0xff]  ;;  %v65_v1 = vld [vmem:[#allocation5 + $0x70] sm:$0xff]  ;;  %s279_s26 = smov [#allocation7]   ;;  %s141_s30 = sshll.u32 %s321_s3, 4  ;;  %s142_s30 = int_to_ptr.hbm [resolvable:$true] %s141_s30 }
   0xd   :  { %v82_v2 = vld [vmem:[#allocation5 + $0xf8] sm:$0xff]  ;;  %155 = vmatpush.msra.mxu2 %v66_v0  ;;  %v81_v3 = vld [vmem:[#allocation5 + $0xf0] sm:$0xff]  ;;  %v64_v4 = vld [vmem:[#allocation5 + $0x68] sm:$0xff]  ;;  %87 = vmatpush.msra.mxu0 %v66_v0  ;;  %s139_s27 = sshll.u32 %s279_s26, 4  ;;  %s140_s27 = int_to_ptr.vmem [resolvable:$true] %s139_s27 }
   0xe   :  { %171 = vmatpush.msra.mxu3 %v82_v2  ;;  %v80_v5 = vld [vmem:[#allocation5 + $0xe8] sm:$0xff]  ;;  %110 = vmatpush.msra.mxu1 %v82_v2  ;;  %v63_v6 = vld [vmem:[#allocation5 + $0x60] sm:$0xff]  ;;  %v62_v8 = vld [vmem:[#allocation5 + $0x58] sm:$0xff] }
   0xf   :  { %156 = vmatpush.msra.mxu2 %v65_v1  ;;  %88 = vmatpush.msra.mxu0 %v65_v1  ;;  %v79_v7 = vld [vmem:[#allocation5 + $0xe0] sm:$0xff]  ;;  %v78_v9 = vld [vmem:[#allocation5 + $0xd8] sm:$0xff]  ;;  %v61_v10 = vld [vmem:[#allocation5 + $0x50] sm:$0xff] }
  0x10   :  { %172 = vmatpush.msra.mxu3 %v81_v3  ;;  %111 = vmatpush.msra.mxu1 %v81_v3  ;;  %v77_v11 = vld [vmem:[#allocation5 + $0xd0] sm:$0xff]  ;;  %v60_v12 = vld [vmem:[#allocation5 + $0x48] sm:$0xff]  ;;  %v59_v14 = vld [vmem:[#allocation5 + $0x40] sm:$0xff] }
  0x11   :  { %157 = vmatpush.msra.mxu2 %v64_v4  ;;  %89 = vmatpush.msra.mxu0 %v64_v4  ;;  %v76_v13 = vld [vmem:[#allocation5 + $0xc8] sm:$0xff]  ;;  %v75_v15 = vld [vmem:[#allocation5 + $0xc0] sm:$0xff]  ;;  %v58_v16 = vld [vmem:[#allocation5 + $0x38] sm:$0xff] }
  0x12   :  { %173 = vmatpush.msra.mxu3 %v80_v5  ;;  %112 = vmatpush.msra.mxu1 %v80_v5  ;;  %v74_v17 = vld [vmem:[#allocation5 + $0xb8] sm:$0xff]  ;;  %v57_v18 = vld [vmem:[#allocation5 + $0x30] sm:$0xff]  ;;  %v56_v20 = vld [vmem:[#allocation5 + $0x28] sm:$0xff] }
  0x13   :  { %158 = vmatpush.msra.mxu2 %v63_v6  ;;  %90 = vmatpush.msra.mxu0 %v63_v6  ;;  %v73_v19 = vld [vmem:[#allocation5 + $0xb0] sm:$0xff]  ;;  %v72_v21 = vld [vmem:[#allocation5 + $0xa8] sm:$0xff]  ;;  %v55_v22 = vld [vmem:[#allocation5 + $0x20] sm:$0xff] }
  0x14   :  { %174 = vmatpush.msra.mxu3 %v79_v7  ;;  %113 = vmatpush.msra.mxu1 %v79_v7  ;;  %v71_v23 = vld [vmem:[#allocation5 + $0xa0] sm:$0xff]  ;;  %v54_v24 = vld [vmem:[#allocation5 + $0x18] sm:$0xff]  ;;  %v53_v26 = vld [vmem:[#allocation5 + $0x10] sm:$0xff] }
  0x15   :  { %159 = vmatpush.msra.mxu2 %v62_v8  ;;  %91 = vmatpush.msra.mxu0 %v62_v8  ;;  %v70_v25 = vld [vmem:[#allocation5 + $0x98] sm:$0xff]  ;;  %v69_v27 = vld [vmem:[#allocation5 + $0x90] sm:$0xff]  ;;  %v52_v28 = vld [vmem:[#allocation5 + $0x8] sm:$0xff] }
  0x16   :  { %175 = vmatpush.msra.mxu3 %v78_v9  ;;  %114 = vmatpush.msra.mxu1 %v78_v9  ;;  %v68_v29 = vld [vmem:[#allocation5 + $0x88] sm:$0xff]  ;;  %v51_v30 = vld [vmem:[#allocation5] sm:$0xff]  ;;  %v49_v32 = vld [vmem:[#allocation2 + $0x10] sm:$0xff] }
  0x17   :  { %160 = vmatpush.msra.mxu2 %v61_v10  ;;  %92 = vmatpush.msra.mxu0 %v61_v10  ;;  %v67_v31 = vld [vmem:[#allocation5 + $0x80] sm:$0xff]  ;;  %v50_v33 = vld [vmem:[#allocation2 + $0x18] sm:$0xff]  ;;  %v48_v35 = vld [vmem:[#allocation2 + $0x8] sm:$0xff] }
  0x18   :  { %176 = vmatpush.msra.mxu3 %v77_v11  ;;  %115 = vmatpush.msra.mxu1 %v77_v11  ;;  %v47_v34 = vld [vmem:[#allocation2] sm:$0xff] }
  0x19   :  { %161 = vmatpush.msra.mxu2 %v60_v12  ;;  %93 = vmatpush.msra.mxu0 %v60_v12  ;;  %v194_v36 = vld [vmem:[%s320_s2] ss:$0 sm:$0xff] }
  0x1a   :  { %177 = vmatpush.msra.mxu3 %v76_v13  ;;  %116 = vmatpush.msra.mxu1 %v76_v13 }
  0x1b   :  { %162 = vmatpush.msra.mxu2 %v59_v14  ;;  %94 = vmatpush.msra.mxu0 %v59_v14 }
  0x1c   :  { %178 = vmatpush.msra.mxu3 %v75_v15  ;;  %117 = vmatpush.msra.mxu1 %v75_v15 }
  0x1d   :  { %163 = vmatpush.msra.mxu2 %v58_v16  ;;  %95 = vmatpush.msra.mxu0 %v58_v16 }
  0x1e   :  { %179 = vmatpush.msra.mxu3 %v74_v17  ;;  %118 = vmatpush.msra.mxu1 %v74_v17 }
  0x1f   :  { %164 = vmatpush.msra.mxu2 %v57_v18  ;;  %96 = vmatpush.msra.mxu0 %v57_v18 }
  0x20   :  { %180 = vmatpush.msra.mxu3 %v73_v19  ;;  %119 = vmatpush.msra.mxu1 %v73_v19 }
  0x21   :  { %165 = vmatpush.msra.mxu2 %v56_v20  ;;  %97 = vmatpush.msra.mxu0 %v56_v20 }
  0x22   :  { %181 = vmatpush.msra.mxu3 %v72_v21  ;;  %120 = vmatpush.msra.mxu1 %v72_v21 }
  0x23   :  { %166 = vmatpush.msra.mxu2 %v55_v22  ;;  %98 = vmatpush.msra.mxu0 %v55_v22 }
  0x24   :  { %182 = vmatpush.msra.mxu3 %v71_v23  ;;  %121 = vmatpush.msra.mxu1 %v71_v23 }
  0x25   :  { %167 = vmatpush.msra.mxu2 %v54_v24  ;;  %99 = vmatpush.msra.mxu0 %v54_v24 }
  0x26   :  { %183 = vmatpush.msra.mxu3 %v70_v25  ;;  %122 = vmatpush.msra.mxu1 %v70_v25 }
  0x27   :  { %168 = vmatpush.msra.mxu2 %v53_v26  ;;  %100 = vmatpush.msra.mxu0 %v53_v26 }
  0x28   :  { %184 = vmatpush.msra.mxu3 %v69_v27  ;;  %123 = vmatpush.msra.mxu1 %v69_v27 }
  0x29   :  { %169 = vmatpush.msra.mxu2 %v52_v28  ;;  %101 = vmatpush.msra.mxu0 %v52_v28 }
  0x2a   :  { %185 = vmatpush.msra.mxu3 %v68_v29  ;;  %124 = vmatpush.msra.mxu1 %v68_v29 }
  0x2b   :  { %170 = vmatpush.msra.mxu2 %v51_v30  ;;  %102 = vmatpush.msra.mxu0 %v51_v30 }
  0x2c   :  { %186 = vmatpush.msra.mxu3 %v67_v31  ;;  %106 = vmatmul.f32.vlgmr.msra.gmra.mxu2 %v49_v32 }
  0x2d   :  { %129 = vmatmul.f32.vlgmr.msra.gmra.mxu3 %v50_v33  ;;  %125 = vmatpush.msra.mxu1 %v67_v31 }
  0x2e   :  { %103 = vmatmul.f32.vlgmr.msra.gmra.mxu0 %v47_v34  ;;  %126 = vmatmul.f32.vlgmr.msra.gmra.mxu1 %v48_v35 }
  0xab   :  { %v104_v37 = vpop.f32.mrf.mxu0  ;;  %v127_v38 = vpop.f32.mrf.mxu1 }
  0xac   :  { %v105_v39 = vadd.f32 %v194_v36, %v104_v37 }
  0xae   :  { %v128_v40 = vadd.f32 %v127_v38, %v105_v39 }
  0xaf   :  { %v107_v41 = vpop.f32.mrf.mxu2 }
  0xb0   :  { %v130_v42 = vpop.f32.mrf.mxu3  ;;  %v108_v43 = vadd.f32 %v194_v36, %v107_v41  ;;  %133 = vst [vmem:[#allocation7] sm:$0xff] %v128_v40 }
  0xb2   :  { %v131_v44 = vadd.f32 %v130_v42, %v108_v43 }
  0xb4   :  { %134 = vst [vmem:[#allocation7 + $0x8] sm:$0xff] %v131_v44 }
  0xb5   :  { %147 = dma.vmem_to_hbm [thread:$0]  %s140_s27, 256, %s142_s30, [#allocation4], %s277_s24, %s277_s24, %s278_s25  }
  0xb6   :  { %271 = dma.done.wait [#allocation4], 256  }
  0xb7   :  { %272 = vsyncadd [#allocation4], 4294967040 }
  0xb8   :  { %152 = vsyncpa [#allocation3], 1 }
  0xb9   :  { %153 = vsyncpa [#allocation6], 1 }
  0xba   :  { %154 = vsyncpa [#allocation4], 1 }

</bundles_post_ra>
